<compile_context>
chip_gen: v7x
topology: tpu7x:2x2x1
jax: 0.10.0
libtpu: 0.0.40
codegen_flags: <defaults>
</compile_context>

<pallas_src>
import functools

import jax
import jax.numpy as jnp
from jax import lax
from jax.experimental import pallas as pl
from jax.experimental.pallas import tpu as pltpu

_VMEM_LIMIT = 48 * 1024 * 1024  # above 16/32 MiB default scoped limits, below v7x 64 MiB physical


def _round_up(x, m):
    return (x + m - 1) // m * m


def _row_tile(n, block_rows):
    """Rows per tile: multiple of 16 (bf16 sublane packing); >=2 grid steps when rows allow."""
    tm = min(block_rows, _round_up(n, 16))
    if _round_up(n, 16) >= 32:
        tm = min(tm, _round_up(pl.cdiv(n, 2), 16))
    n_pad = _round_up(n, tm)
    return tm, n_pad


# ----------------------------- Pallas kernels -----------------------------

def _linear_kernel(x_ref, w_ref, b_ref, o_ref, *, activation):
    # y = x @ W + b   (W pre-transposed, bf16 operands, f32 accumulation)
    y = jnp.dot(x_ref[...], w_ref[...], preferred_element_type=jnp.float32)
    y = y + b_ref[...]
    if activation == "elu":
        y = jnp.where(y > 0, y, jnp.expm1(jnp.minimum(y, 0.0)))
    o_ref[...] = y.astype(o_ref.dtype)


def pallas_linear(x_bf16, w_bf16, b_f32, activation=None, out_dtype=jnp.float32,
                  block_rows=512):
    """x [N, Din] bf16, W [Din, Dout] bf16 (pre-transposed), b [1, Dout] f32 -> [N, Dout]."""
    n, din = x_bf16.shape
    dout = w_bf16.shape[1]
    tm, n_pad = _row_tile(n, block_rows)
    if n_pad != n:
        x_bf16 = jnp.pad(x_bf16, ((0, n_pad - n), (0, 0)))
    out = pl.pallas_call(
        functools.partial(_linear_kernel, activation=activation),
        out_shape=jax.ShapeDtypeStruct((n_pad, dout), out_dtype),
        grid=(n_pad // tm,),
        in_specs=[pl.BlockSpec((tm, din), lambda i: (i, 0)),
                  pl.BlockSpec((din, dout), lambda i: (0, 0)),   # weight stays VMEM-resident
                  pl.BlockSpec((1, dout), lambda i: (0, 0))],
        out_specs=pl.BlockSpec((tm, dout), lambda i: (i, 0)),
        compiler_params=pltpu.CompilerParams(
            dimension_semantics=("parallel",), vmem_limit_bytes=_VMEM_LIMIT),
    )(x_bf16, w_bf16, b_f32)
    return out[:n] if n_pad != n else out


def _charcnn_kernel(x_ref, w_ref, b_ref, o_ref, *, ksize, l_out):
    # Conv1d(padding=K-1) -> max over time -> tanh, expressed as K accumulated MXU matmuls
    # (no im2col concat / channel relayout):  y[:, t, :] = sum_k x[:, t+k, :] @ W_k
    nt = x_ref.shape[0]
    cd = x_ref.shape[2]
    fp = w_ref.shape[2]
    x = x_ref[...]                       # [Nt, L_pad, Cd] bf16
    w = w_ref[...]                       # [K, Cd, Fp] bf16
    acc = None
    for k in range(ksize):
        xk = x[:, k:k + l_out, :].reshape(nt * l_out, cd)
        yk = jnp.dot(xk, w[k], preferred_element_type=jnp.float32)   # [Nt*L_out, Fp]
        acc = yk if acc is None else acc + yk
    y = acc.reshape(nt, l_out, fp)
    o_ref[...] = jnp.tanh(jnp.max(y, axis=1) + b_ref[...])           # lane-dense (Fp=128k) store


def pallas_char_cnn(x_pad_bf16, w_k_cd_fp, b_1fp, *, kernel_size, block_rows=512):
    n, l_pad, cd = x_pad_bf16.shape
    l_out = l_pad - (kernel_size - 1)
    fp = w_k_cd_fp.shape[2]
    tm, n_pad = _row_tile(n, block_rows)
    if n_pad != n:
        x_pad_bf16 = jnp.pad(x_pad_bf16, ((0, n_pad - n), (0, 0), (0, 0)))
    out = pl.pallas_call(
        functools.partial(_charcnn_kernel, ksize=kernel_size, l_out=l_out),
        out_shape=jax.ShapeDtypeStruct((n_pad, fp), jnp.float32),
        grid=(n_pad // tm,),
        in_specs=[pl.BlockSpec((tm, l_pad, cd), lambda i: (i, 0, 0)),
                  pl.BlockSpec((kernel_size, cd, fp), lambda i: (0, 0, 0)),
                  pl.BlockSpec((1, fp), lambda i: (0, 0))],
        out_specs=pl.BlockSpec((tm, fp), lambda i: (i, 0)),
        compiler_params=pltpu.CompilerParams(
            dimension_semantics=("parallel",), vmem_limit_bytes=_VMEM_LIMIT),
    )(x_pad_bf16, w_k_cd_fp, b_1fp)
    return out[:n] if n_pad != n else out


def _bilstm_kernel(gx_ref, whh_ref, m_ref, out_ref, *, seq_len, hp):
    # Both directions fused in one body: two independent recurrence chains interleaved per
    # time step so MXU/EUP bundle slots stay occupied (a lone [Bp,Hp]@[Hp,4Hp] matmul badly
    # under-fills them on every chip generation).
    # gx: [T, Bp, 8Hp] bf16 (fwd gates lanes [0,4Hp), bwd [4Hp,8Hp)); whh: [Hp, 8Hp] bf16;
    # m: [T, Bp, 1] f32; out: [T, Bp, 2Hp] bf16 (fwd hidden lanes [0,Hp), bwd [Hp,2Hp)).
    wf = whh_ref[:, pl.ds(0, 4 * hp)]            # hoisted out of the recurrence
    wb = whh_ref[:, pl.ds(4 * hp, 4 * hp)]
    bp = gx_ref.shape[1]

    def cell(gates, h, c, mt):
        # VarMaskedFastLSTM cell (gate order i,f,g,o) with masked state interpolation.
        ig = jax.nn.sigmoid(gates[:, 0 * hp:1 * hp])
        fg = jax.nn.sigmoid(gates[:, 1 * hp:2 * hp])
        gg = jnp.tanh(gates[:, 2 * hp:3 * hp])
        og = jax.nn.sigmoid(gates[:, 3 * hp:4 * hp])
        c_new = fg * c + ig * gg
        h_new = og * jnp.tanh(c_new)
        return h + (h_new - h) * mt, c + (c_new - c) * mt

    def step(i, carry):
        hf, cf, hb, cb = carry                   # f32 state
        t_f = i
        t_b = seq_len - 1 - i
        gf = gx_ref[t_f, :, pl.ds(0, 4 * hp)].astype(jnp.float32) + jnp.dot(
            hf.astype(jnp.bfloat16), wf, preferred_element_type=jnp.float32)
        gb = gx_ref[t_b, :, pl.ds(4 * hp, 4 * hp)].astype(jnp.float32) + jnp.dot(
            hb.astype(jnp.bfloat16), wb, preferred_element_type=jnp.float32)
        hf2, cf2 = cell(gf, hf, cf, m_ref[t_f])
        hb2, cb2 = cell(gb, hb, cb, m_ref[t_b])
        out_ref[t_f, :, pl.ds(0, hp)] = hf2.astype(out_ref.dtype)
        out_ref[t_b, :, pl.ds(hp, hp)] = hb2.astype(out_ref.dtype)
        return (hf2, cf2, hb2, cb2)

    zeros = jnp.zeros((bp, hp), jnp.float32)
    lax.fori_loop(0, seq_len, step, (zeros, zeros, zeros, zeros), unroll=2)


def pallas_bilstm(gx_tm_bf16, whh_fused, mask_tm, hp):
    """gx [T,Bp,8Hp] bf16 (dir-major gate slabs), whh [Hp,8Hp] bf16, mask [T,Bp,1] f32
    -> [T,Bp,2Hp] bf16 with forward hidden in lanes [0,Hp) and backward in [Hp,2Hp)."""
    T, Bp, _ = gx_tm_bf16.shape
    return pl.pallas_call(
        functools.partial(_bilstm_kernel, seq_len=T, hp=hp),
        out_shape=jax.ShapeDtypeStruct((T, Bp, 2 * hp), jnp.bfloat16),
        grid=(1,),
        in_specs=[pl.BlockSpec((T, Bp, 8 * hp), lambda i: (0, 0, 0)),
                  pl.BlockSpec((hp, 8 * hp), lambda i: (0, 0)),
                  pl.BlockSpec((T, Bp, 1), lambda i: (0, 0, 0))],
        out_specs=pl.BlockSpec((T, Bp, 2 * hp), lambda i: (0, 0, 0)),
        compiler_params=pltpu.CompilerParams(
            dimension_semantics=("arbitrary",), vmem_limit_bytes=_VMEM_LIMIT),
    )(gx_tm_bf16, whh_fused, mask_tm)


def _biaffine_kernel(x_ref, u_ref, wd_ref, we_ref, b_ref, mcol_ref, mrow_ref, o_ref, *, ap):
    # score[i,j] = h_i U c_j + wd.h_i + we.c_j + b, masked by m_i*m_j  (one batch row / step).
    # x = [arc_h | arc_c] lane slabs (128-aligned).  The `we` term is folded into the first
    # matmul as a row-vector add; the second contraction stays in f32 (precision), and the
    # `wd` term is a VPU multiply + XLU lane reduce.
    h = x_ref[:, :ap]                     # [L, Ap] f32 (decoder / arc_h)
    c = x_ref[:, ap:]                     # [L, Ap] f32 (encoder / arc_c)
    hu = jnp.dot(h.astype(jnp.bfloat16), u_ref[...],
                 preferred_element_type=jnp.float32)                  # [L, Ap]
    hu = hu + we_ref[...]
    bil = lax.dot_general(hu, c, (((1,), (1,)), ((), ())),
                          preferred_element_type=jnp.float32)          # [L, L], f32 MXU
    d = jnp.sum(h * wd_ref[...], axis=1, keepdims=True)                # [L, 1]
    o_ref[...] = (bil + d + b_ref[...]) * mcol_ref[...] * mrow_ref[...]


def pallas_biaffine(heads_bm, u, wd, we, bias, mask, ap):
    """heads_bm [Bp, L, Dp] f32 batch-major (arc_h/arc_c in the first 2*Ap lanes),
    u [Ap,Ap] bf16, wd/we [1,Ap] f32, bias [1,1] f32, mask [B,L] f32 -> [B,L,L] f32."""
    B, L = mask.shape
    mcol = mask.reshape(B, L, 1)
    mrow = mask.reshape(B, 1, L)
    return pl.pallas_call(
        functools.partial(_biaffine_kernel, ap=ap),
        out_shape=jax.ShapeDtypeStruct((B, L, L), jnp.float32),
        grid=(B,),                                              # >=2 steps for B>=2 (v7x 2 TCs)
        in_specs=[pl.BlockSpec((None, L, 2 * ap), lambda b: (b, 0, 0)),
                  pl.BlockSpec((ap, ap), lambda b: (0, 0)),
                  pl.BlockSpec((1, ap), lambda b: (0, 0)),
                  pl.BlockSpec((1, ap), lambda b: (0, 0)),
                  pl.BlockSpec((1, 1), lambda b: (0, 0)),
                  pl.BlockSpec((None, L, 1), lambda b: (b, 0, 0)),
                  pl.BlockSpec((None, 1, L), lambda b: (b, 0, 0))],
        out_specs=pl.BlockSpec((None, L, L), lambda b: (b, 0, 0)),
        compiler_params=pltpu.CompilerParams(
            dimension_semantics=("parallel",), vmem_limit_bytes=_VMEM_LIMIT),
    )(heads_bm, u, wd, we, bias, mcol, mrow)


# ----------------------------- parameters ---------------------------------

def init_params(cfg, key):
    keys = iter(jax.random.split(key, 64))

    def nrm(shape, scale=0.1):
        return scale * jax.random.normal(next(keys), shape, jnp.float32)

    H = cfg["hidden_size"]
    dim_enc = cfg["word_dim"] + cfg["num_filters"] + cfg["pos_dim"]

    params = {
        "word_emb": nrm((cfg["num_words"], cfg["word_dim"])),
        "char_emb": nrm((cfg["num_chars"], cfg["char_dim"])),
        "pos_emb":  nrm((cfg["num_pos"], cfg["pos_dim"])),
        "conv_w":   nrm((cfg["num_filters"], cfg["char_dim"], cfg["kernel_size"])),
        "conv_b":   nrm((cfg["num_filters"],)),
    }

    rnn = []
    for layer in range(cfg["num_layers"]):
        din = dim_enc if layer == 0 else 2 * H
        dirs = []
        for _ in range(2):  # forward / backward
            dirs.append({
                "w_ih": nrm((4 * H, din)),
                "w_hh": nrm((4 * H, H)),
                "b_ih": nrm((4 * H,)),
                "b_hh": nrm((4 * H,)),
            })
        rnn.append(dirs)
    params["rnn"] = rnn

    A, Ts = cfg["arc_space"], cfg["type_space"]
    params.update({
        "arc_h_w": nrm((A, 2 * H)),  "arc_h_b": nrm((A,)),
        "arc_c_w": nrm((A, 2 * H)),  "arc_c_b": nrm((A,)),
        "type_h_w": nrm((Ts, 2 * H)), "type_h_b": nrm((Ts,)),
        "type_c_w": nrm((Ts, 2 * H)), "type_c_b": nrm((Ts,)),
        "att_u":  nrm((1, A, A)),
        "att_wd": nrm((1, A)),
        "att_we": nrm((1, A)),
        "att_b":  nrm((1, 1, 1)),
    })
    return params


def prepare_params(params, cfg):
    """One-time re-layout: pre-transpose, pad every lane-facing width (gates per-gate to Hp,
    char filters to Fp, each projection head to Ap/Tsp) to a 128 multiple, fuse the two RNN
    directions and the four projection heads, cast matmul operands to bf16.
    NOTE: production hidden/arc/type sizes are usually multiples of 128, in which case all
    this padding is a no-op; for the toy sizes here it multiplies work but keeps lane slices
    aligned, which is what the TPU wants."""
    H = cfg["hidden_size"]
    Hp = _round_up(H, 128)
    A, Ts = cfg["arc_space"], cfg["type_space"]
    Ap, Tsp = _round_up(A, 128), _round_up(Ts, 128)
    K, Cd, F = cfg["kernel_size"], cfg["char_dim"], cfg["num_filters"]
    Fp = _round_up(F, 128)
    Wd, Pd = cfg["word_dim"], cfg["pos_dim"]

    def pad_gate_cols(w_t):                 # [din, 4H] -> [din, 4Hp]
        din = w_t.shape[0]
        out = jnp.zeros((din, 4 * Hp), jnp.float32)
        for g in range(4):
            out = out.at[:, g * Hp:g * Hp + H].set(w_t[:, g * H:(g + 1) * H])
        return out

    def pad_gate_vec(v):                    # [4H] -> [4Hp]
        out = jnp.zeros((4 * Hp,), jnp.float32)
        for g in range(4):
            out = out.at[g * Hp:g * Hp + H].set(v[g * H:(g + 1) * H])
        return out

    def spread_hidden_rows(w_t):            # [2H, Dout] -> [2Hp, Dout] (fwd rows at 0, bwd at Hp)
        dout = w_t.shape[1]
        out = jnp.zeros((2 * Hp, dout), jnp.float32)
        out = out.at[0:H, :].set(w_t[0:H, :])
        out = out.at[Hp:Hp + H, :].set(w_t[H:2 * H, :])
        return out

    def spread_enc_rows(w_t):               # [Wd+F+Pd, Dout] -> [Wd+Fp+Pd, Dout] (char padded)
        dout = w_t.shape[1]
        out = jnp.zeros((Wd + Fp + Pd, dout), jnp.float32)
        out = out.at[0:Wd, :].set(w_t[0:Wd, :])
        out = out.at[Wd:Wd + F, :].set(w_t[Wd:Wd + F, :])
        out = out.at[Wd + Fp:Wd + Fp + Pd, :].set(w_t[Wd + F:Wd + F + Pd, :])
        return out

    prep = {
        "word_emb": params["word_emb"],
        "char_emb": params["char_emb"],
        "pos_emb": params["pos_emb"],
    }

    # conv_w [F, Cd, K] -> per-k [K, Cd, Fp] (accumulated-matmul form, filters padded to 128)
    conv_w = jnp.transpose(params["conv_w"], (2, 1, 0))                    # [K, Cd, F]
    prep["conv_w"] = (jnp.zeros((K, Cd, Fp), jnp.float32)
                      .at[:, :, :F].set(conv_w).astype(jnp.bfloat16))
    prep["conv_b"] = jnp.zeros((1, Fp), jnp.float32).at[0, :F].set(params["conv_b"])

    rnn = []
    for layer, dirs in enumerate(params["rnn"]):
        w_ih_cols, whh_cols, b_cols = [], [], []
        for p in dirs:
            w_ih_t = jnp.transpose(p["w_ih"])                              # [din, 4H]
            w_ih_t = spread_enc_rows(w_ih_t) if layer == 0 else spread_hidden_rows(w_ih_t)
            w_ih_cols.append(pad_gate_cols(w_ih_t))                        # [din_p, 4Hp]
            whh_t = jnp.zeros((Hp, 4 * H), jnp.float32).at[0:H, :].set(jnp.transpose(p["w_hh"]))
            whh_cols.append(pad_gate_cols(whh_t))                          # [Hp, 4Hp]
            b_cols.append(pad_gate_vec(p["b_ih"] + p["b_hh"]))
        rnn.append({
            "w_ih": jnp.concatenate(w_ih_cols, axis=1).astype(jnp.bfloat16),   # [din_p, 8Hp]
            "w_hh": jnp.concatenate(whh_cols, axis=1).astype(jnp.bfloat16),    # [Hp, 8Hp]
            "b": jnp.concatenate(b_cols).reshape(1, 8 * Hp),                   # f32
        })
    prep["rnn"] = rnn

    # fused projection heads, each head padded to its own 128-lane slab:
    # columns [arc_h(0:Ap) | arc_c(Ap:2Ap) | type_h(2Ap:2Ap+Tsp) | type_c(2Ap+Tsp:2Ap+2Tsp)]
    Dp = 2 * Ap + 2 * Tsp
    heads_w = jnp.zeros((2 * Hp, Dp), jnp.float32)
    heads_b = jnp.zeros((1, Dp), jnp.float32)
    for off, w, b, width in ((0, params["arc_h_w"], params["arc_h_b"], A),
                             (Ap, params["arc_c_w"], params["arc_c_b"], A),
                             (2 * Ap, params["type_h_w"], params["type_h_b"], Ts),
                             (2 * Ap + Tsp, params["type_c_w"], params["type_c_b"], Ts)):
        heads_w = heads_w.at[:, off:off + width].set(spread_hidden_rows(jnp.transpose(w)))
        heads_b = heads_b.at[0, off:off + width].set(b)
    prep["heads_w"] = heads_w.astype(jnp.bfloat16)
    prep["heads_b"] = heads_b

    # biaffine params zero-padded to Ap lanes (padded lanes contribute exactly 0)
    prep["att_u"] = (jnp.zeros((Ap, Ap), jnp.float32)
                     .at[:A, :A].set(params["att_u"][0]).astype(jnp.bfloat16))
    prep["att_wd"] = jnp.zeros((1, Ap), jnp.float32).at[0, :A].set(params["att_wd"][0])
    prep["att_we"] = jnp.zeros((1, Ap), jnp.float32).at[0, :A].set(params["att_we"][0])
    prep["att_b"] = params["att_b"].reshape(1, 1)
    prep["layout"] = dict(Hp=Hp, Ap=Ap, Tsp=Tsp, Fp=Fp)
    return prep


# ------------------------------- forward -----------------------------------

def forward(prep, cfg, input_word, input_char, input_pos, mask=None):
    B, L = input_word.shape
    if mask is None:
        mask = jnp.ones((B, L), jnp.float32)
    mask = mask.astype(jnp.float32)

    lay = prep["layout"]
    Hp, Ap, Tsp, Fp = lay["Hp"], lay["Ap"], lay["Tsp"], lay["Fp"]
    Ts = cfg["type_space"]
    K = cfg["kernel_size"]

    # --- embeddings gathered directly in time-major order (no [B,L,D] HBM transpose);
    #     dropout_in is identity at inference ---
    word_tm = prep["word_emb"][input_word.T]                         # [L, B, Wd]
    pos_tm = prep["pos_emb"][input_pos.T]                            # [L, B, Pd]
    char_tm = prep["char_emb"][jnp.transpose(input_char, (1, 0, 2))]  # [L, B, Cl, Cd]

    # --- char CNN: Conv1d(padding=K-1) -> max over time -> tanh (K accumulated matmuls) ---
    Cl, Cd = char_tm.shape[2], char_tm.shape[3]
    N = L * B
    x_pad = jnp.pad(char_tm.reshape(N, Cl, Cd),
                    ((0, 0), (K - 1, K - 1), (0, 0))).astype(jnp.bfloat16)
    char_feat = pallas_char_cnn(x_pad, prep["conv_w"], prep["conv_b"],
                                kernel_size=K).reshape(L, B, Fp)     # filters padded to Fp

    # --- concat [word, char(Fp), pos]; pad batch to 8 sublanes ---
    rnn_in = jnp.concatenate([word_tm, char_feat, pos_tm], axis=2)   # [L, B, Wd+Fp+Pd]
    Bp = _round_up(B, 8)
    mask_tm = jnp.transpose(mask, (1, 0))                            # [L, B]
    if Bp != B:
        rnn_in = jnp.pad(rnn_in, ((0, 0), (0, Bp - B), (0, 0)))
        mask_tm = jnp.pad(mask_tm, ((0, 0), (0, Bp - B)))
    mask_tm = mask_tm.reshape(L, Bp, 1)

    # --- stacked bidirectional VarMaskedFastLSTM (eval mode; both directions fused) ---
    layer_in = rnn_in
    for layer_p in prep["rnn"]:
        din = layer_in.shape[2]
        gx = pallas_linear(layer_in.reshape(L * Bp, din).astype(jnp.bfloat16),
                           layer_p["w_ih"], layer_p["b"],
                           out_dtype=jnp.bfloat16)                   # bf16 gx halves HBM+VMEM
        gx_tm = gx.reshape(L, Bp, 8 * Hp)
        layer_in = pallas_bilstm(gx_tm, layer_p["w_hh"], mask_tm, Hp)   # [L, Bp, 2Hp] bf16
    output_tm = layer_in                                             # dropout_out identity

    # --- fused arc/type projection heads with ELU (per-head 128-lane-padded columns) ---
    heads = pallas_linear(output_tm.reshape(L * Bp, 2 * Hp),
                          prep["heads_w"], prep["heads_b"], activation="elu")   # [L*Bp, Dp] f32
    # single remaining wrapper relayout: time-major -> batch-major for biaffine / outputs
    heads_bm = jnp.transpose(heads.reshape(L, Bp, -1), (1, 0, 2))    # [Bp, L, Dp]

    # --- BiAffine arc attention (num_labels = 1), masked by m_i * m_j ---
    out_arc = pallas_biaffine(heads_bm, prep["att_u"], prep["att_wd"], prep["att_we"],
                              prep["att_b"], mask, Ap)               # [B, L, L]

    type_h = heads_bm[:B, :, 2 * Ap:2 * Ap + Ts]
    type_c = heads_bm[:B, :, 2 * Ap + Tsp:2 * Ap + Tsp + Ts]
    # TODO(synk): loss()/decode() paths (BiLinear label scorer, log-softmax, MST) are not part
    # of forward() and are not implemented here.
    return out_arc, (type_h, type_c), mask


# ------------------------------- main ---------------------------------------

if __name__ == "__main__":
    cfg = dict(word_dim=16, num_words=50, char_dim=8, num_chars=30,
               pos_dim=8, num_pos=12, num_filters=16, kernel_size=3,
               hidden_size=32, num_layers=1, num_labels=10,
               arc_space=32, type_space=24)

    key = jax.random.PRNGKey(0)
    kp, kw, kc, kpos = jax.random.split(key, 4)
    params = init_params(cfg, kp)
    prep = prepare_params(params, cfg)   # one-time weight re-layout (no per-forward transposes)

    B, L, CL = 2, 8, 6
    input_word = jax.random.randint(kw, (B, L), 0, cfg["num_words"])
    input_char = jax.random.randint(kc, (B, L, CL), 0, cfg["num_chars"])
    input_pos = jax.random.randint(kpos, (B, L), 0, cfg["num_pos"])
    # second sentence has length 6 (exercises the masked LSTM / biaffine mask)
    mask = jnp.ones((B, L), jnp.float32).at[1, 6:].set(0.0)

    out_arc, (type_h, type_c), mask_out = forward(
        prep, cfg, input_word, input_char, input_pos, mask)
    jax.block_until_ready((out_arc, type_h, type_c))

    assert out_arc.shape == (B, L, L)
    assert type_h.shape == (B, L, cfg["type_space"])
    assert type_c.shape == (B, L, cfg["type_space"])
    assert bool(jnp.all(jnp.isfinite(out_arc)))
    print("KERNEL_OK")
</pallas_src>

<mosaic_0001>
module attributes {stable_mosaic.version = 11 : i64} {
  func.func @_charcnn_kernel(%arg0: i32, %arg1: memref<16x10x8xbf16, #tpu.memory_space<vmem>>, %arg2: memref<3x8x128xbf16, #tpu.memory_space<vmem>>, %arg3: memref<1x128xf32, #tpu.memory_space<vmem>>, %arg4: memref<16x128xf32, #tpu.memory_space<vmem>>) attributes {dimension_semantics = [#tpu.dimension_semantics<parallel>], iteration_bounds = array<i64: 1>, scalar_prefetch = 0 : i64, scratch_operands = 0 : i64, tpu.core_type = #tpu.core_type<tc>, window_params = [{transform_indices = @transform_0, window_bounds = array<i64: 16, 10, 8>}, {pipeline_mode = #tpu.pipeline_mode<synchronous>, transform_indices = @transform_1, window_bounds = array<i64: 3, 8, 128>}, {pipeline_mode = #tpu.pipeline_mode<synchronous>, transform_indices = @transform_2, window_bounds = array<i64: 1, 128>}, {transform_indices = @transform_3, window_bounds = array<i64: 16, 128>}]} {
    %c0 = arith.constant 0 : index
    %c0_0 = arith.constant 0 : index
    %c0_1 = arith.constant 0 : index
    %0 = vector.load %arg1[%c0, %c0_0, %c0_1] : memref<16x10x8xbf16, #tpu.memory_space<vmem>>, vector<16x10x8xbf16>
    %c0_2 = arith.constant 0 : index
    %c0_3 = arith.constant 0 : index
    %c0_4 = arith.constant 0 : index
    %1 = vector.load %arg2[%c0_2, %c0_3, %c0_4] : memref<3x8x128xbf16, #tpu.memory_space<vmem>>, vector<3x8x128xbf16>
    %2 = vector.extract_strided_slice %0 {offsets = [0, 0, 0], sizes = [16, 8, 8], strides = [1, 1, 1]} : vector<16x10x8xbf16> to vector<16x8x8xbf16>
    %3 = vector.shape_cast %2 : vector<16x8x8xbf16> to vector<128x8xbf16>
    %4 = vector.extract_strided_slice %1 {offsets = [0, 0, 0], sizes = [1, 8, 128], strides = [1, 1, 1]} : vector<3x8x128xbf16> to vector<1x8x128xbf16>
    %5 = vector.shape_cast %4 : vector<1x8x128xbf16> to vector<8x128xbf16>
    %cst = arith.constant dense<0.000000e+00> : vector<128x128xf32>
    %6 = tpu.matmul %3, %5, %cst {dimension_numbers = #tpu.dot_dimension_numbers<[1], [0], [0], [1], [0, 0, 1, 1], [], []>} : vector<128x8xbf16>, vector<8x128xbf16>, vector<128x128xf32> -> vector<128x128xf32>
    %7 = vector.extract_strided_slice %0 {offsets = [0, 1, 0], sizes = [16, 8, 8], strides = [1, 1, 1]} : vector<16x10x8xbf16> to vector<16x8x8xbf16>
    %8 = vector.shape_cast %7 : vector<16x8x8xbf16> to vector<128x8xbf16>
    %9 = vector.extract_strided_slice %1 {offsets = [1, 0, 0], sizes = [1, 8, 128], strides = [1, 1, 1]} : vector<3x8x128xbf16> to vector<1x8x128xbf16>
    %10 = vector.shape_cast %9 : vector<1x8x128xbf16> to vector<8x128xbf16>
    %cst_5 = arith.constant dense<0.000000e+00> : vector<128x128xf32>
    %11 = tpu.matmul %8, %10, %cst_5 {dimension_numbers = #tpu.dot_dimension_numbers<[1], [0], [0], [1], [0, 0, 1, 1], [], []>} : vector<128x8xbf16>, vector<8x128xbf16>, vector<128x128xf32> -> vector<128x128xf32>
    %12 = arith.addf %6, %11 : vector<128x128xf32>
    %13 = vector.extract_strided_slice %0 {offsets = [0, 2, 0], sizes = [16, 8, 8], strides = [1, 1, 1]} : vector<16x10x8xbf16> to vector<16x8x8xbf16>
    %14 = vector.shape_cast %13 : vector<16x8x8xbf16> to vector<128x8xbf16>
    %15 = vector.extract_strided_slice %1 {offsets = [2, 0, 0], sizes = [1, 8, 128], strides = [1, 1, 1]} : vector<3x8x128xbf16> to vector<1x8x128xbf16>
    %16 = vector.shape_cast %15 : vector<1x8x128xbf16> to vector<8x128xbf16>
    %cst_6 = arith.constant dense<0.000000e+00> : vector<128x128xf32>
    %17 = tpu.matmul %14, %16, %cst_6 {dimension_numbers = #tpu.dot_dimension_numbers<[1], [0], [0], [1], [0, 0, 1, 1], [], []>} : vector<128x8xbf16>, vector<8x128xbf16>, vector<128x128xf32> -> vector<128x128xf32>
    %18 = arith.addf %12, %17 : vector<128x128xf32>
    %19 = vector.shape_cast %18 : vector<128x128xf32> to vector<16x8x128xf32>
    %cst_7 = arith.constant dense<0xFF800000> : vector<16x128xf32>
    %20 = vector.multi_reduction <maximumf>, %19, %cst_7 [1] : vector<16x8x128xf32> to vector<16x128xf32>
    %c0_8 = arith.constant 0 : index
    %c0_9 = arith.constant 0 : index
    %21 = vector.load %arg3[%c0_8, %c0_9] : memref<1x128xf32, #tpu.memory_space<vmem>>, vector<1x128xf32>
    %22 = vector.broadcast %21 : vector<1x128xf32> to vector<16x128xf32>
    %23 = arith.addf %20, %22 : vector<16x128xf32>
    %24 = math.tanh %23 : vector<16x128xf32>
    %c0_10 = arith.constant 0 : index
    %c0_11 = arith.constant 0 : index
    %25 = vector.load %arg4[%c0_10, %c0_11] : memref<16x128xf32, #tpu.memory_space<vmem>>, vector<16x128xf32>
    tpu.vector_store %arg4[%c0_10, %c0_11], %24 {strides = array<i32>} : memref<16x128xf32, #tpu.memory_space<vmem>>, vector<16x128xf32>,
    return
  }
  func.func @transform_0(%arg0: i32) -> (i32, i32, i32) {
    %c0_i32 = arith.constant 0 : i32
    %c0_i32_0 = arith.constant 0 : i32
    %c0_i32_1 = arith.constant 0 : i32
    return %arg0, %c0_i32, %c0_i32_0 : i32, i32, i32
  }
  func.func @transform_1(%arg0: i32) -> (i32, i32, i32) {
    %c0_i32 = arith.constant 0 : i32
    %c0_i32_0 = arith.constant 0 : i32
    %c0_i32_1 = arith.constant 0 : i32
    %c0_i32_2 = arith.constant 0 : i32
    return %c0_i32, %c0_i32_0, %c0_i32_1 : i32, i32, i32
  }
  func.func @transform_2(%arg0: i32) -> (i32, i32) {
    %c0_i32 = arith.constant 0 : i32
    %c0_i32_0 = arith.constant 0 : i32
    %c0_i32_1 = arith.constant 0 : i32
    return %c0_i32, %c0_i32_0 : i32, i32
  }
  func.func @transform_3(%arg0: i32) -> (i32, i32) {
    %c0_i32 = arith.constant 0 : i32
    %c0_i32_0 = arith.constant 0 : i32
    return %arg0, %c0_i32 : i32, i32
  }
}

</mosaic_0001>

<bundles_post_ra>
// kernel: tpu_custom_call.1
= control target key start
LH: loop header
LB: loop body
LE: loop exit
PB: predicated region body
PF: predicated region fallthrough
CT: control target
= control target key end

     0   :  { %vm327_vm0 = vcmask 1043456   ;;  %vm302_vm1 = vcmask 64512   ;;  %vm51_vm2 = vsmask.f32 3328  ;;  %vm52_vm3 = vsmask.f32 7440  ;;  %s1749_s0 = inlined_call_operand.vmem [shape: bf16[16,10,8], index: 0, kind: input, shape index: {}]   ;;  %s1750_s1 = inlined_call_operand.vmem [shape: bf16[3,8,128], index: 1, kind: input, shape index: {}]   ;;  %s1751_s2 = inlined_call_operand.vmem [shape: f32[1,128], index: 2, kind: input, shape index: {}]   ;;  %s1752_s3 = inlined_call_operand.hbm [shape: f32[16,128], index: 3, kind: output, shape index: {}]  }
   0x1   :  { %v48_v0 = vld [vmem:[%s1750_s1] sm:$0xf]  ;;  %v1334_v3 = vld [vmem:[%s1749_s0 + $0x8] sm:$0xf]  ;;  %v1348_v11 = vld [vmem:[%s1749_s0 + $0x10] sm:$0xf] }
   0x2   :  { %v1325_v1 = vld [vmem:[%s1749_s0] sm:$0xf]  ;;  %1226 = vmatprep.subr.msk.bf16.mxu0 %vm327_vm0, %v48_v0  ;;  %v1329_v2 = vsel %vm327_vm0, %v48_v0, 0  ;;  %v69_v7 = vshrl.u32 %v1334_v3, 16  ;;  %v72_v8 = vshll.u32 %v1334_v3, 16  ;;  %v1078_v10 = vrot.slane %v1334_v3, 9  ;;  %vm1389_vm4 = vmor %vm51_vm2, %vm52_vm3 }
   0x3   :  { %v55_v4 = vshrl.u32 %v1325_v1, 16  ;;  %v58_v5 = vshll.u32 %v1325_v1, 16  ;;  %v1077_v6 = vrot.slane %v1325_v1, 9  ;;  %1156 = vmatpush3.bf16.msra.mxu0 %v1329_v2  ;;  %v1061_v9 = vcombine.low %v1325_v1, %v1334_v3  ;;  %v1353_v12 = vld [vmem:[%s1749_s0 + $0x18] sm:$0xf] }
   0x4   :  { %v83_v13 = vshrl.u32 %v1348_v11, 16  ;;  %v86_v14 = vshll.u32 %v1348_v11, 16  ;;  %v1079_v15 = vrot.slane %v1348_v11, 9  ;;  %v97_v17 = vshrl.u32 %v1353_v12, 16  ;;  %v49_v21 = vld [vmem:[%s1750_s1 + $0x4] sm:$0xf] }
   0x5   :  { %v57_v16 = vrot.slane %v55_v4, 4  ;;  %1157 = vmatprep.mubr.msk.bf16.mxu0 %vm302_vm1, %v1061_v9  ;;  %v100_v18 = vshll.u32 %v1353_v12, 16  ;;  %v1062_v19 = vcombine.low %v1348_v11, %v1353_v12  ;;  %v1080_v20 = vrot.slane %v1353_v12, 9  ;;  %1225 = vmatprep.subr.msk.bf16.mxu1 %vm327_vm0, %v49_v21  ;;  %v1372_v23 = vld [vmem:[%s1749_s0 + $0x4] sm:$0x1] }
   0x6   :  { %v329_v22 = vsel %vm327_vm0, %v49_v21, 0  ;;  %v1377_v24 = vld [vmem:[%s1749_s0 + $0xc] sm:$0x1]  ;;  %v60_v25 = vrot.slane %v58_v5, 5  ;;  %v64_v26 = vshll.u32 %v1372_v23, 16  ;;  %v71_v27 = vrot.slane %v69_v7, 4 }
   0x7   :  { %1158 = vmatmul.mubr.msk.bf16.vlgmr.msra.gmra.mrb[0].mxu0 %vm302_vm1, %v1062_v19  ;;  %1138 = vmatpush3.bf16.msra.mxu1 %v329_v22  ;;  %v74_v29 = vrot.slane %v72_v8, 5  ;;  %v78_v30 = vshll.u32 %v1377_v24, 16  ;;  %v613_v31 = vrot.slane %v1372_v23, 5  ;;  %v1387_v32 = vld [vmem:[%s1749_s0 + $0x20] sm:$0xf]  ;;  %v617_v35 = vrot.slane %v1377_v24, 5 }
   0x8   :  { %v61_v28 = vor.u32 %v60_v25, %v57_v16  ;;  %1227 = vmatprep.subr.msk.bf16.mxu1 %vm327_vm0, %v48_v0  ;;  %v66_v34 = vrot.slane %v64_v26, 5  ;;  %v1397_v36 = vld [vmem:[%s1749_s0 + $0x28] sm:$0xf]  ;;  %v111_v37 = vshrl.u32 %v1387_v32, 16  ;;  %v114_v38 = vshll.u32 %v1387_v32, 16 }
   0x9   :  { %v75_v40 = vor.u32 %v74_v29, %v71_v27  ;;  %v80_v41 = vrot.slane %v78_v30, 5  ;;  %v125_v42 = vshrl.u32 %v1397_v36, 16  ;;  %v50_v43 = vld [vmem:[%s1750_s1 + $0x8] sm:$0xf]  ;;  %v128_v44 = vshll.u32 %v1397_v36, 16 }
   0xa   :  { %v62_v39 = vrot.slane %v61_v28, 4  ;;  %v1063_v45 = vcombine.low %v1387_v32, %v1397_v36  ;;  %1228 = vmatprep.subr.msk.bf16.mxu0 %vm327_vm0, %v50_v43  ;;  %v1412_v46 = vld [vmem:[%s1749_s0 + $0x14] sm:$0x1]  ;;  %v1417_v47 = vld [vmem:[%s1749_s0 + $0x1c] sm:$0x1]  ;;  %v85_v48 = vrot.slane %v83_v13, 4 }
   0xb   :  { %v76_v50 = vrot.slane %v75_v40, 4  ;;  %v88_v51 = vrot.slane %v86_v14, 5  ;;  %v92_v52 = vshll.u32 %v1412_v46, 16  ;;  %v1425_v53 = vld [vmem:[%s1749_s0 + $0x30] sm:$0xf]  ;;  %v99_v54 = vrot.slane %v97_v17, 4 }
   0xc   :  { %v67_v49 = vsel %vm1389_vm4, %v62_v39, %v66_v34  ;;  %1161 = vmatprep.mubr.msk.bf16.mxu0 %vm302_vm1, %v1063_v45  ;;  %v102_v55 = vrot.slane %v100_v18, 5  ;;  %v106_v56 = vshll.u32 %v1417_v47, 16  ;;  %v621_v57 = vrot.slane %v1412_v46, 5  ;;  %v1433_v58 = vld [vmem:[%s1749_s0 + $0x38] sm:$0xf] }
   0xd   :  { %v81_v59 = vsel %vm1389_vm4, %v76_v50, %v80_v41  ;;  %v89_v60 = vor.u32 %v88_v51, %v85_v48  ;;  %v94_v61 = vrot.slane %v92_v52, 5  ;;  %v625_v62 = vrot.slane %v1417_v47, 5  ;;  %v1442_v7 = vld [vmem:[%s1749_s0 + $0x24] sm:$0x1]  ;;  %v1450_v16 = vld [vmem:[%s1749_s0 + $0x2c] sm:$0x1] }
   0xe   :  { %v1045_v63 = vcombine.low %v67_v49, %v81_v59  ;;  %v103_v0 = vor.u32 %v102_v55, %v99_v54  ;;  %v108_v4 = vrot.slane %v106_v56, 5  ;;  %v139_v5 = vshrl.u32 %v1425_v53, 16  ;;  %v1466_v34 = vld [vmem:[%s1749_s0 + $0x34] sm:$0x1]  ;;  %v1495_v1 = vld [vmem:[%s1749_s0 + $0x40] sm:$0xf] }
   0xf   :  { %v90_v8 = vrot.slane %v89_v60, 4  ;;  %v142_v9 = vshll.u32 %v1425_v53, 16  ;;  %v153_v13 = vshrl.u32 %v1433_v58, 16  ;;  %v156_v14 = vshll.u32 %v1433_v58, 16  ;;  %v1519_v56 = vld [vmem:[%s1749_s0 + $0x48] sm:$0xf] }
  0x10   :  { %1139 = vmatprep.mubr.msk.bf16.mxu1 %vm302_vm1, %v1045_v63  ;;  %v104_v17 = vrot.slane %v103_v0, 4  ;;  %v1064_v18 = vcombine.low %v1425_v53, %v1433_v58  ;;  %v724_v19 = vsel %vm327_vm0, %v50_v43, 0  ;;  %v113_v21 = vrot.slane %v111_v37, 4  ;;  %v1475_v43 = vld [vmem:[%s1749_s0 + $0x3c] sm:$0x1] }
  0x11   :  { %v95_v22 = vsel %vm1389_vm4, %v90_v8, %v94_v61  ;;  %1174 = vmatpush3.bf16.msra.mxu0 %v724_v19  ;;  %v116_v25 = vrot.slane %v114_v38, 5  ;;  %v120_v26 = vshll.u32 %v1442_v7, 16  ;;  %v127_v27 = vrot.slane %v125_v42, 4  ;;  %v1524_v59 = vld [vmem:[%s1749_s0 + $0x4c] sm:$0x1] }
  0x12   :  { %v109_v28 = vsel %vm1389_vm4, %v104_v17, %v108_v4  ;;  %1162 = vmatmul.mubr.msk.bf16.gmra.mrb[4].mxu0 %vm302_vm1, %v1064_v18  ;;  %v130_v29 = vrot.slane %v128_v44, 5  ;;  %v134_v30 = vshll.u32 %v1450_v16, 16  ;;  %vm608_vm5 = vcmask 1042432  }
  0x13   :  { %v1046_v37 = vcombine.low %v95_v22, %v109_v28  ;;  %v117_v39 = vor.u32 %v116_v25, %v113_v21  ;;  %v122_v38 = vrot.slane %v120_v26, 5  ;;  %vm609_vm6 = vcmask 1046532  }
  0x14   :  { %v131_v40 = vor.u32 %v130_v29, %v127_v27  ;;  %v136_v41 = vrot.slane %v134_v30, 5  ;;  %vm1468_vm7 = vmor %vm608_vm5, %vm609_vm6  ;;  %v141_v44 = vrot.slane %v139_v5, 4  ;;  %v144_v45 = vrot.slane %v142_v9, 5 }
  0x15   :  { %1140 = vmatmul.mubr.msk.bf16.vlgmr.msra.gmra.mrb[0].mxu1 %vm302_vm1, %v1046_v37  ;;  %v118_v46 = vrot.slane %v117_v39, 4  ;;  %v614_v47 = vsel %vm1468_vm7, %v1077_v6, %v613_v31  ;;  %v618_v48 = vsel %vm1468_vm7, %v1078_v10, %v617_v35  ;;  %v148_v49 = vshll.u32 %v1466_v34, 16 }
  0x16   :  { %1192 = vmatpush3.bf16.msra.mxu1 %v1329_v2  ;;  %v132_v50 = vrot.slane %v131_v40, 4  ;;  %v1093_v51 = vcombine.low %v614_v47, %v618_v48  ;;  %v145_v52 = vor.u32 %v144_v45, %v141_v44  ;;  %v155_v23 = vrot.slane %v153_v13, 4  ;;  %v1503_v2 = vld [vmem:[%s1749_s0 + $0x44] sm:$0x1] }
  0x17   :  { %v123_v6 = vsel %vm1389_vm4, %v118_v46, %v122_v38  ;;  %v150_v3 = vrot.slane %v148_v49, 5  ;;  %v158_v24 = vrot.slane %v156_v14, 5  ;;  %v162_v10 = vshll.u32 %v1475_v43, 16 }
  0x18   :  { %v137_v31 = vsel %vm1389_vm4, %v132_v50, %v136_v41  ;;  %1175 = vmatprep.mubr.msk.bf16.mxu0 %vm302_vm1, %v1093_v51  ;;  %v146_v35 = vrot.slane %v145_v52, 4  ;;  %v622_v54 = vsel %vm1468_vm7, %v1079_v15, %v621_v57  ;;  %v626_v55 = vsel %vm1468_vm7, %v1080_v20, %v625_v62 }
  0x19   :  { %v1047_v60 = vcombine.low %v123_v6, %v137_v31  ;;  %v159_v11 = vor.u32 %v158_v24, %v155_v23  ;;  %v164_v61 = vrot.slane %v162_v10, 5  ;;  %v1094_v63 = vcombine.low %v622_v54, %v626_v55 }
  0x1a   :  { %v151_v12 = vsel %vm1389_vm4, %v146_v35, %v150_v3  ;;  %v167_v15 = vshrl.u32 %v1495_v1, 16  ;;  %v170_v20 = vshll.u32 %v1495_v1, 16  ;;  %v176_v57 = vshll.u32 %v1503_v2, 16 }
  0x1b   :  { %8 = vsyncpa [#allocation3], 0  ;;  %1143 = vmatprep.mubr.msk.bf16.mxu1 %vm302_vm1, %v1047_v60  ;;  %v160_v62 = vrot.slane %v159_v11, 4  ;;  %1176 = vmatmul.mubr.msk.bf16.vlgmr.msra.gmra.mrb[0].mxu0 %vm302_vm1, %v1094_v63  ;;  %v181_v0 = vshrl.u32 %v1519_v56, 16  ;;  %v184_v4 = vshll.u32 %v1519_v56, 16  ;;  %v190_v5 = vshll.u32 %v1524_v59, 16 }
  0x1c   :  { %v1539_v8 = vld [vmem:[%s1749_s0 + $0x50] sm:$0xf]  ;;  %v169_v9 = vrot.slane %v167_v15, 4  ;;  %v172_v13 = vrot.slane %v170_v20, 5  ;;  %v178_v14 = vrot.slane %v176_v57, 5  ;;  %v1081_v17 = vrot.slane %v1387_v32, 9 }
  0x1d   :  { %v1545_v18 = vld [vmem:[%s1749_s0 + $0x54] sm:$0x1]  ;;  %v165_v19 = vsel %vm1389_vm4, %v160_v62, %v164_v61  ;;  %v183_v21 = vrot.slane %v181_v0, 4  ;;  %v186_v22 = vrot.slane %v184_v4, 5  ;;  %v192_v25 = vrot.slane %v190_v5, 5 }
  0x1e   :  { %v1552_v26 = vld [vmem:[%s1749_s0 + $0x58] sm:$0xf]  ;;  %v1048_v27 = vcombine.low %v151_v12, %v165_v19  ;;  %v173_v28 = vor.u32 %v172_v13, %v169_v9  ;;  %v629_v32 = vrot.slane %v1442_v7, 5  ;;  %v1082_v29 = vrot.slane %v1397_v36, 9  ;;  %v1565_v44 = vld [vmem:[%s1749_s0 + $0x5c] sm:$0x1] }
  0x1f   :  { %v187_v30 = vor.u32 %v186_v22, %v183_v21  ;;  %v633_v37 = vrot.slane %v1450_v16, 5  ;;  %v195_v39 = vshrl.u32 %v1539_v8, 16  ;;  %v198_v38 = vshll.u32 %v1539_v8, 16  ;;  %v1580_v24 = vld [vmem:[%s1749_s0 + $0x60] sm:$0xf] }
  0x20   :  { %1144 = vmatmul.mubr.msk.bf16.gmra.mrb[4].mxu1 %vm302_vm1, %v1048_v27  ;;  %v174_v40 = vrot.slane %v173_v28, 4  ;;  %v630_v41 = vsel %vm1468_vm7, %v1081_v17, %v629_v32  ;;  %v204_v36 = vshll.u32 %v1545_v18, 16  ;;  %v209_v7 = vshrl.u32 %v1552_v26, 16  ;;  %v1585_v10 = vld [vmem:[%s1749_s0 + $0x64] sm:$0x1] }
  0x21   :  { %v188_v16 = vrot.slane %v187_v30, 4  ;;  %v634_v45 = vsel %vm1468_vm7, %v1082_v29, %v633_v37  ;;  %v197_v46 = vrot.slane %v195_v39, 4  ;;  %v200_v47 = vrot.slane %v198_v38, 5  ;;  %v1594_v60 = vld [vmem:[%s1749_s0 + $0x68] sm:$0xf] }
  0x22   :  { %v179_v48 = vsel %vm1389_vm4, %v174_v40, %v178_v14  ;;  %v1095_v49 = vcombine.low %v630_v41, %v634_v45  ;;  %v206_v50 = vrot.slane %v204_v36, 5  ;;  %v211_v51 = vrot.slane %v209_v7, 4  ;;  %v1616_v4 = vld [vmem:[%s1749_s0 + $0x70] sm:$0xf]  ;;  %v1621_v5 = vld [vmem:[%s1749_s0 + $0x74] sm:$0x1] }
  0x23   :  { %v193_v52 = vsel %vm1389_vm4, %v188_v16, %v192_v25  ;;  %v201_v23 = vor.u32 %v200_v47, %v197_v46  ;;  %v212_v6 = vshll.u32 %v1552_v26, 16  ;;  %v218_v3 = vshll.u32 %v1565_v44, 16  ;;  %v1626_v19 = vld [vmem:[%s1749_s0 + $0x78] sm:$0xf]  ;;  %v47_v40 = vld [vmem:[%s1749_s0 + $0x7c] sm:$0x1] }
  0x24   :  { %v1049_v31 = vcombine.low %v179_v48, %v193_v52  ;;  %1179 = vmatprep.mubr.msk.bf16.mxu0 %vm302_vm1, %v1095_v49  ;;  %v1083_v35 = vrot.slane %v1425_v53, 9  ;;  %v637_v54 = vrot.slane %v1466_v34, 5  ;;  %v1084_v55 = vrot.slane %v1433_v58, 9  ;;  %v1603_v53 = vld [vmem:[%s1749_s0 + $0x6c] sm:$0x1] }
  0x25   :  { %v202_v11 = vrot.slane %v201_v23, 4  ;;  %v214_v61 = vrot.slane %v212_v6, 5  ;;  %v220_v63 = vrot.slane %v218_v3, 5  ;;  %v641_v12 = vrot.slane %v1475_v43, 5 }
  0x26   :  { %1147 = vmatprep.mubr.msk.bf16.mxu1 %vm302_vm1, %v1049_v31  ;;  %v638_v15 = vsel %vm1468_vm7, %v1083_v35, %v637_v54  ;;  %v223_v58 = vshrl.u32 %v1580_v24, 16  ;;  %v226_v34 = vshll.u32 %v1580_v24, 16  ;;  %v232_v20 = vshll.u32 %v1585_v10, 16 }
  0x27   :  { %v207_v57 = vsel %vm1389_vm4, %v202_v11, %v206_v50  ;;  %v215_v43 = vor.u32 %v214_v61, %v211_v51  ;;  %v642_v62 = vsel %vm1468_vm7, %v1084_v55, %v641_v12  ;;  %v237_v0 = vshrl.u32 %v1594_v60, 16 }
  0x28   :  { %v1096_v9 = vcombine.low %v638_v15, %v642_v62  ;;  %v225_v13 = vrot.slane %v223_v58, 4  ;;  %v228_v14 = vrot.slane %v226_v34, 5  ;;  %v234_v17 = vrot.slane %v232_v20, 5 }
  0x29   :  { %v216_v21 = vrot.slane %v215_v43, 4  ;;  %v239_v22 = vrot.slane %v237_v0, 4  ;;  %v240_v25 = vshll.u32 %v1594_v60, 16  ;;  %v246_v27 = vshll.u32 %v1603_v53, 16 }
  0x2a   :  { %1180 = vmatmul.mubr.msk.bf16.gmra.mrb[4].mxu0 %vm302_vm1, %v1096_v9  ;;  %v229_v28 = vor.u32 %v228_v14, %v225_v13  ;;  %v251_v32 = vshrl.u32 %v1616_v4, 16  ;;  %v254_v29 = vshll.u32 %v1616_v4, 16  ;;  %v260_v30 = vshll.u32 %v1621_v5, 16 }
  0x2b   :  { %v221_v37 = vsel %vm1389_vm4, %v216_v21, %v220_v63  ;;  %v242_v39 = vrot.slane %v240_v25, 5  ;;  %v248_v38 = vrot.slane %v246_v27, 5  ;;  %v265_v41 = vshrl.u32 %v1626_v19, 16 }
  0x2c   :  { %v1050_v36 = vcombine.low %v207_v57, %v221_v37  ;;  %v230_v7 = vrot.slane %v229_v28, 4  ;;  %v253_v16 = vrot.slane %v251_v32, 4  ;;  %v256_v45 = vrot.slane %v254_v29, 5 }
  0x2d   :  { %v243_v46 = vor.u32 %v242_v39, %v239_v22  ;;  %v262_v47 = vrot.slane %v260_v30, 5  ;;  %v267_v48 = vrot.slane %v265_v41, 4  ;;  %v268_v49 = vshll.u32 %v1626_v19, 16 }
  0x2e   :  { %1148 = vmatmul.mubr.msk.bf16.gmra.mrb[8].mxu1 %vm302_vm1, %v1050_v36  ;;  %v235_v50 = vsel %vm1389_vm4, %v230_v7, %v234_v17  ;;  %v257_v51 = vor.u32 %v256_v45, %v253_v16  ;;  %v274_v52 = vshll.u32 %v47_v40, 16  ;;  %v1085_v23 = vrot.slane %v1495_v1, 9 }
  0x2f   :  { %v244_v6 = vrot.slane %v243_v46, 4  ;;  %v270_v3 = vrot.slane %v268_v49, 5  ;;  %v645_v31 = vrot.slane %v1503_v2, 5  ;;  %v1086_v35 = vrot.slane %v1519_v56, 9 }
  0x30   :  { %v258_v54 = vrot.slane %v257_v51, 4  ;;  %v276_v55 = vrot.slane %v274_v52, 5  ;;  %v649_v11 = vrot.slane %v1524_v59, 5  ;;  %v1087_v61 = vrot.slane %v1539_v8, 9 }
  0x31   :  { %v249_v63 = vsel %vm1389_vm4, %v244_v6, %v248_v38  ;;  %v271_v12 = vor.u32 %v270_v3, %v267_v48  ;;  %v646_v15 = vsel %vm1468_vm7, %v1085_v23, %v645_v31  ;;  %v653_v58 = vrot.slane %v1545_v18, 5 }
  0x32   :  { %v1051_v34 = vcombine.low %v235_v50, %v249_v63  ;;  %v263_v2 = vsel %vm1389_vm4, %v258_v54, %v262_v47  ;;  %v650_v20 = vsel %vm1468_vm7, %v1086_v35, %v649_v11  ;;  %v1088_v59 = vrot.slane %v1552_v26, 9 }
  0x33   :  { %v272_v57 = vrot.slane %v271_v12, 4  ;;  %v1097_v43 = vcombine.low %v646_v15, %v650_v20  ;;  %v654_v62 = vsel %vm1468_vm7, %v1087_v61, %v653_v58  ;;  %v657_v0 = vrot.slane %v1565_v44, 5  ;;  %v1702_v15 = vld [vmem:[%s1751_s2] ss:$0 sm:$0xff]  ;;  %s1296_s2 = smov [#allocation2]  }
  0x34   :  { %1151 = vmatprep.mubr.msk.bf16.mxu1 %vm302_vm1, %v1051_v34  ;;  %v1065_v18 = vcombine.low %v1495_v1, %v1519_v56  ;;  %v1089_v9 = vrot.slane %v1580_v24, 9  ;;  %v661_v13 = vrot.slane %v1585_v10, 5  ;;  %v1090_v21 = vrot.slane %v1594_v60, 9  ;;  %s1034_s27 = sshll.u32 %s1296_s2, 4  ;;  %s1035_s27 = int_to_ptr.vmem [resolvable:$true] %s1034_s27 }
  0x35   :  { %v277_v14 = vsel %vm1389_vm4, %v272_v57, %v276_v55  ;;  %1183 = vmatprep.mubr.msk.bf16.mxu0 %vm302_vm1, %v1097_v43  ;;  %v658_v17 = vsel %vm1468_vm7, %v1088_v59, %v657_v0  ;;  %v665_v44 = vrot.slane %v1603_v53, 5  ;;  %v1091_v56 = vrot.slane %v1616_v4, 9  ;;  %s1272_s28 = scalar_lea.vmem %s1035_s27, 256  ;;  %p1277_p1 = scmp.lt.s32.totalorder %s1035_s27, %s1035_s27 }
  0x36   :  { %v1052_v22 = vcombine.low %v263_v2, %v277_v14  ;;  %v1098_v25 = vcombine.low %v654_v62, %v658_v17  ;;  %v662_v1 = vsel %vm1468_vm7, %v1089_v9, %v661_v13  ;;  %v669_v10 = vrot.slane %v1621_v5, 5  ;;  %p1273_p0 = scmp.ne.s32.totalorder %s1035_s27, %s1272_s28  ;;  %p1278_p2 = scmp.lt.s32.totalorder %s1272_s28, %s1272_s28 }
  0x37   :  { %v666_v33 = vsel %vm1468_vm7, %v1090_v21, %v665_v44  ;;  %v1092_v27 = vrot.slane %v1626_v19, 9  ;;  %v673_v28 = vrot.slane %v47_v40, 5  ;;  %v1066_v5 = vcombine.low %v1539_v8, %v1552_v26 }
  0x38   :  { %1152 = vmatmul.mubr.msk.bf16.gmra.mrb[12].mxu1 %vm302_vm1, %v1052_v22  ;;  %1184 = vmatmul.mubr.msk.bf16.gmra.mrb[8].mxu0 %vm302_vm1, %v1098_v25  ;;  %v1099_v53 = vcombine.low %v662_v1, %v666_v33  ;;  %v670_v32 = vsel %vm1468_vm7, %v1091_v56, %v669_v10  ;;  %v1067_v37 = vcombine.low %v1580_v24, %v1594_v60  ;;  %vm991_vm8 = vcmask 1041409   ;;  %p1279_p3 = por %p1278_p2, %p1277_p1 }
  0x39   :  { %1165 = vmatprep.mubr.msk.bf16.mxu1 %vm302_vm1, %v1065_v18  ;;  %v674_v29 = vsel %vm1468_vm7, %v1092_v27, %v673_v28  ;;  %v1068_v39 = vcombine.low %v1616_v4, %v1626_v19  ;;  %vm994_vm9 = vcmask 1042434   ;;  %vm997_vm10 = vcmask 1043459  }
  0x3a   :  { %1187 = vmatprep.mubr.msk.bf16.mxu0 %vm302_vm1, %v1099_v53  ;;  %v1100_v30 = vcombine.low %v670_v32, %v674_v29  ;;  %vm1000_vm11 = vcmask 1044484   ;;  %vm1003_vm12 = vcmask 1045509   ;;  %vm1006_vm13 = vcmask 1046534   ;;  %p1280_p4 = pnand %p1279_p3, %p1273_p0 }
  0x3b   :  { %vm1009_vm14 = vcmask 1047559  }
  0x40   :  { %1166 = vmatmul.mubr.msk.bf16.vlgmr.msra.gmra.mrb[8].mxu1 %vm302_vm1, %v1066_v5  ;;  %1188 = vmatmul.mubr.msk.bf16.gmra.mrb[12].mxu0 %vm302_vm1, %v1100_v30 }
  0x41   :  { %1169 = vmatprep.mubr.msk.bf16.mxu1 %vm302_vm1, %v1067_v37 }
  0x48   :  { %1170 = vmatmul.mubr.msk.bf16.gmra.mrb[12].mxu1 %vm302_vm1, %v1068_v39 }
  0xe8   :  { %v1141_v42 = vpop.f32.mrb[0].mxu1 }
  0xe9   :  { %v365_v38 = vpop.f32.mrb[1].mxu1 }
  0xea   :  { %v1142_v40 = vpop.f32.mrb[2].mxu1 }
  0xeb   :  { %v368_v41 = vpop.f32.mrb[3].mxu1 }
  0xee   :  { %v1177_v8 = vpop.f32.mrb[0].mxu0 }
  0xef   :  { %v1193_v26 = vadd.f32 %v1177_v8, %v1141_v42  ;;  %v760_v36 = vpop.f32.mrb[1].mxu0 }
  0xf0   :  { %v1194_v7 = vadd.f32 %v760_v36, %v365_v38  ;;  %v1178_v24 = vpop.f32.mrb[2].mxu0 }
  0xf1   :  { %v851_v60 = vrot.slane %v1193_v26, 4  ;;  %v1195_v16 = vadd.f32 %v1178_v24, %v1142_v40  ;;  %v763_v45 = vpop.f32.mrb[3].mxu0 }
  0xf2   :  { %v839_v46 = vrot.slane %v1194_v7, 4  ;;  %v1196_v47 = vadd.f32 %v763_v45, %v368_v41 }
  0xf3   :  { %v1145_v48 = vpop.f32.mrb[4].mxu1  ;;  %v852_v49 = vmax.f32 %v1193_v26, %v851_v60  ;;  %v857_v50 = vrot.slane %v1195_v16, 4 }
  0xf4   :  { %v381_v4 = vpop.f32.mrb[5].mxu1  ;;  %v840_v19 = vmax.f32 %v1194_v7, %v839_v46  ;;  %v845_v51 = vrot.slane %v1196_v47, 4 }
  0xf5   :  { %v853_v52 = vrot.slane %v852_v49, 2  ;;  %v1146_v23 = vpop.f32.mrb[6].mxu1  ;;  %v858_v6 = vmax.f32 %v1195_v16, %v857_v50 }
  0xf6   :  { %v841_v3 = vrot.slane %v840_v19, 2  ;;  %v384_v31 = vpop.f32.mrb[7].mxu1  ;;  %v846_v35 = vmax.f32 %v1196_v47, %v845_v51 }
  0xf7   :  { %v854_v54 = vmax.f32 %v852_v49, %v853_v52  ;;  %v859_v55 = vrot.slane %v858_v6, 2 }
  0xf8   :  { %v842_v11 = vmax.f32 %v840_v19, %v841_v3  ;;  %v847_v61 = vrot.slane %v846_v35, 2 }
  0xf9   :  { %v855_v63 = vrot.slane %v854_v54, 1  ;;  %v860_v12 = vmax.f32 %v858_v6, %v859_v55 }
  0xfa   :  { %v843_v58 = vrot.slane %v842_v11, 1  ;;  %v848_v34 = vmax.f32 %v846_v35, %v847_v61 }
  0xfb   :  { %v856_v2 = vmax.f32 %v854_v54, %v855_v63  ;;  %v861_v20 = vrot.slane %v860_v12, 1 }
  0xfc   :  { %v844_v59 = vmax.f32 %v842_v11, %v843_v58  ;;  %v849_v57 = vrot.slane %v848_v34, 1 }
  0xfd   :  { %v944_v43 = vadd.f32 %v1702_v15, %v856_v2  ;;  %v862_v62 = vmax.f32 %v860_v12, %v861_v20  ;;  %v1181_v0 = vpop.f32.mrb[4].mxu0 }
  0xfe   :  { %v850_v18 = vmax.f32 %v848_v34, %v849_v57  ;;  %v1197_v9 = vadd.f32 %v1181_v0, %v1145_v48  ;;  %v776_v13 = vpop.f32.mrb[5].mxu0  ;;  %v942_v14 = vadd.f32 %v1702_v15, %v844_v59 }
  0xff   :  { %v945_v17 = vadd.f32 %v1702_v15, %v862_v62  ;;  %v1198_v21 = vadd.f32 %v776_v13, %v381_v4  ;;  %v1182_v44 = vpop.f32.mrb[6].mxu0  ;;  %1240 = vtanh.f32 %v944_v43 }
 0x100   :  { %v943_v22 = vadd.f32 %v1702_v15, %v850_v18  ;;  %v875_v25 = vrot.slane %v1197_v9, 4  ;;  %v1199_v1 = vadd.f32 %v1182_v44, %v1146_v23  ;;  %v779_v56 = vpop.f32.mrb[7].mxu0 }
 0x101   :  { %1242 = vtanh.f32 %v945_v17  ;;  %v863_v33 = vrot.slane %v1198_v21, 4  ;;  %v1200_v10 = vadd.f32 %v779_v56, %v384_v31 }
 0x102   :  { %1244 = vtanh.f32 %v943_v22  ;;  %v876_v27 = vmax.f32 %v1197_v9, %v875_v25  ;;  %v881_v28 = vrot.slane %v1199_v1, 4 }
 0x103   :  { %v864_v53 = vmax.f32 %v1198_v21, %v863_v33  ;;  %v869_v32 = vrot.slane %v1200_v10, 4  ;;  %1246 = vtanh.f32 %v942_v14 }
 0x104   :  { %v877_v29 = vrot.slane %v876_v27, 2  ;;  %v882_v5 = vmax.f32 %v1199_v1, %v881_v28 }
 0x105   :  { %v865_v30 = vrot.slane %v864_v53, 2  ;;  %v870_v37 = vmax.f32 %v1200_v10, %v869_v32 }
 0x106   :  { %v878_v39 = vmax.f32 %v876_v27, %v877_v29  ;;  %v883_v42 = vrot.slane %v882_v5, 2 }
 0x107   :  { %v866_v38 = vmax.f32 %v864_v53, %v865_v30  ;;  %v871_v40 = vrot.slane %v870_v37, 2 }
 0x108   :  { %v879_v41 = vrot.slane %v878_v39, 1  ;;  %v884_v8 = vmax.f32 %v882_v5, %v883_v42 }
 0x109   :  { %v867_v26 = vrot.slane %v866_v38, 1  ;;  %v872_v36 = vmax.f32 %v870_v37, %v871_v40  ;;  %v1241_v7 = vpop.eup %1240 }
 0x10a   :  { %v880_v24 = vmax.f32 %v878_v39, %v879_v41  ;;  %v885_v60 = vrot.slane %v884_v8, 1  ;;  %v993_v6 = vrot.slane %v1241_v7, 6 }
 0x10b   :  { %v1243_v16 = vpop.eup %1242  ;;  %v868_v45 = vmax.f32 %v866_v38, %v867_v26  ;;  %v873_v46 = vrot.slane %v872_v36, 1  ;;  %v1185_v47 = vpop.f32.mrb[8].mxu0 }
 0x10c   :  { %v1245_v48 = vpop.eup %1244  ;;  %v948_v49 = vadd.f32 %v1702_v15, %v880_v24  ;;  %v792_v50 = vpop.f32.mrb[9].mxu0  ;;  %v886_v3 = vmax.f32 %v884_v8, %v885_v60  ;;  %v996_v35 = vrot.slane %v1243_v16, 5 }
 0x10d   :  { %v990_v4 = vrot.slane %v1245_v48, 7  ;;  %v946_v19 = vadd.f32 %v1702_v15, %v868_v45  ;;  %v874_v51 = vmax.f32 %v872_v36, %v873_v46  ;;  %v1186_v52 = vpop.f32.mrb[10].mxu0  ;;  %v1247_v23 = vpop.eup %1246 }
 0x10e   :  { %1248 = vtanh.f32 %v948_v49  ;;  %v795_v31 = vpop.f32.mrb[11].mxu0  ;;  %v949_v63 = vadd.f32 %v1702_v15, %v886_v3 }
 0x10f   :  { %v992_v54 = vsel %vm991_vm8, %v990_v4, %v1247_v23  ;;  %1250 = vtanh.f32 %v946_v19  ;;  %v947_v55 = vadd.f32 %v1702_v15, %v874_v51 }
 0x110   :  { %v995_v11 = vsel %vm994_vm9, %v993_v6, %v992_v54 }
 0x111   :  { %1252 = vtanh.f32 %v947_v55  ;;  %v998_v61 = vsel %vm997_vm10, %v996_v35, %v995_v11 }
 0x112   :  { %1254 = vtanh.f32 %v949_v63 }
 0x113   :  { %v1167_v12 = vpop.f32.mrb[8].mxu1  ;;  %v1189_v58 = vpop.f32.mrb[12].mxu0 }
 0x114   :  { %v1201_v34 = vadd.f32 %v1185_v47, %v1167_v12  ;;  %v561_v2 = vpop.f32.mrb[9].mxu1  ;;  %v808_v20 = vpop.f32.mrb[13].mxu0 }
 0x115   :  { %v1202_v59 = vadd.f32 %v792_v50, %v561_v2  ;;  %v1168_v57 = vpop.f32.mrb[10].mxu1  ;;  %v1190_v43 = vpop.f32.mrb[14].mxu0 }
 0x116   :  { %v899_v62 = vrot.slane %v1201_v34, 4  ;;  %v1203_v0 = vadd.f32 %v1186_v52, %v1168_v57  ;;  %v564_v18 = vpop.f32.mrb[11].mxu1  ;;  %v811_v9 = vpop.f32.mrb[15].mxu0 }
 0x117   :  { %v887_v13 = vrot.slane %v1202_v59, 4  ;;  %v1204_v14 = vadd.f32 %v795_v31, %v564_v18 }
 0x118   :  { %v1715_v17 = vpop.eup %1248  ;;  %v900_v21 = vmax.f32 %v1201_v34, %v899_v62  ;;  %v905_v44 = vrot.slane %v1203_v0, 4 }
 0x119   :  { %v1251_v22 = vpop.eup %1250  ;;  %v888_v25 = vmax.f32 %v1202_v59, %v887_v13  ;;  %v893_v1 = vrot.slane %v1204_v14, 4  ;;  %v1005_v28 = vrot.slane %v1715_v17, 2 }
 0x11a   :  { %v999_v56 = vrot.slane %v1251_v22, 4  ;;  %v901_v33 = vrot.slane %v900_v21, 2  ;;  %v906_v10 = vmax.f32 %v1203_v0, %v905_v44 }
 0x11b   :  { %v1253_v27 = vpop.eup %1252  ;;  %v889_v53 = vrot.slane %v888_v25, 2  ;;  %v894_v32 = vmax.f32 %v1204_v14, %v893_v1  ;;  %v1171_v29 = vpop.f32.mrb[12].mxu1 }
 0x11c   :  { %v1002_v5 = vrot.slane %v1253_v27, 3  ;;  %v902_v30 = vmax.f32 %v900_v21, %v901_v33  ;;  %v907_v37 = vrot.slane %v906_v10, 2  ;;  %v1205_v39 = vadd.f32 %v1189_v58, %v1171_v29  ;;  %v577_v42 = vpop.f32.mrb[13].mxu1  ;;  %v1255_v49 = vpop.eup %1254 }
 0x11d   :  { %v890_v38 = vmax.f32 %v888_v25, %v889_v53  ;;  %v895_v40 = vrot.slane %v894_v32, 2  ;;  %v1206_v41 = vadd.f32 %v808_v20, %v577_v42  ;;  %v1172_v8 = vpop.f32.mrb[14].mxu1  ;;  %v1001_v26 = vsel %vm1000_vm11, %v999_v56, %v998_v61 }
 0x11e   :  { %v903_v36 = vrot.slane %v902_v30, 1  ;;  %v908_v7 = vmax.f32 %v906_v10, %v907_v37  ;;  %v923_v24 = vrot.slane %v1205_v39, 4  ;;  %v1207_v60 = vadd.f32 %v1190_v43, %v1172_v8  ;;  %v580_v16 = vpop.f32.mrb[15].mxu1 }
 0x11f   :  { %v891_v45 = vrot.slane %v890_v38, 1  ;;  %v896_v46 = vmax.f32 %v894_v32, %v895_v40  ;;  %v911_v47 = vrot.slane %v1206_v41, 4  ;;  %v1208_v48 = vadd.f32 %v811_v9, %v580_v16 }
 0x120   :  { %v904_v50 = vmax.f32 %v902_v30, %v903_v36  ;;  %v909_v4 = vrot.slane %v908_v7, 1  ;;  %v924_v19 = vmax.f32 %v1205_v39, %v923_v24  ;;  %v929_v51 = vrot.slane %v1207_v60, 4 }
 0x121   :  { %v892_v52 = vmax.f32 %v890_v38, %v891_v45  ;;  %v897_v23 = vrot.slane %v896_v46, 1  ;;  %v912_v6 = vmax.f32 %v1206_v41, %v911_v47  ;;  %v917_v3 = vrot.slane %v1208_v48, 4 }
 0x122   :  { %v952_v31 = vadd.f32 %v1702_v15, %v904_v50  ;;  %v910_v35 = vmax.f32 %v908_v7, %v909_v4  ;;  %v925_v54 = vrot.slane %v924_v19, 2  ;;  %v930_v55 = vmax.f32 %v1207_v60, %v929_v51 }
 0x123   :  { %v1008_v11 = vrot.slane %v1255_v49, 1  ;;  %v898_v61 = vmax.f32 %v896_v46, %v897_v23  ;;  %v913_v63 = vrot.slane %v912_v6, 2  ;;  %v918_v12 = vmax.f32 %v1208_v48, %v917_v3 }
 0x124   :  { %v950_v58 = vadd.f32 %v1702_v15, %v892_v52  ;;  %v953_v34 = vadd.f32 %v1702_v15, %v910_v35  ;;  %v926_v2 = vmax.f32 %v924_v19, %v925_v54  ;;  %v931_v20 = vrot.slane %v930_v55, 2 }
 0x125   :  { %1256 = vtanh.f32 %v952_v31  ;;  %v951_v59 = vadd.f32 %v1702_v15, %v898_v61  ;;  %v914_v57 = vmax.f32 %v912_v6, %v913_v63  ;;  %v919_v43 = vrot.slane %v918_v12, 2 }
 0x126   :  { %1258 = vtanh.f32 %v953_v34  ;;  %v927_v62 = vrot.slane %v926_v2, 1  ;;  %v932_v0 = vmax.f32 %v930_v55, %v931_v20  ;;  %v1004_v18 = vsel %vm1003_vm12, %v1002_v5, %v1001_v26 }
 0x127   :  { %1260 = vtanh.f32 %v951_v59  ;;  %v915_v9 = vrot.slane %v914_v57, 1  ;;  %v920_v13 = vmax.f32 %v918_v12, %v919_v43  ;;  %v1007_v14 = vsel %vm1006_vm13, %v1005_v28, %v1004_v18 }
 0x128   :  { %v928_v17 = vmax.f32 %v926_v2, %v927_v62  ;;  %v933_v21 = vrot.slane %v932_v0, 1  ;;  %v1010_v44 = vsel %vm1009_vm14, %v1008_v11, %v1007_v14  ;;  %1262 = vtanh.f32 %v950_v58 }
 0x129   :  { %v916_v22 = vmax.f32 %v914_v57, %v915_v9  ;;  %v921_v25 = vrot.slane %v920_v13, 1  ;;  %1027 = vst [vmem:[#allocation2] sm:$0xff] %v1010_v44 }
 0x12a   :  { %v956_v1 = vadd.f32 %v1702_v15, %v928_v17  ;;  %v934_v56 = vmax.f32 %v932_v0, %v933_v21 }
 0x12b   :  { %v954_v33 = vadd.f32 %v1702_v15, %v916_v22  ;;  %v922_v10 = vmax.f32 %v920_v13, %v921_v25 }
 0x12c   :  { %1264 = vtanh.f32 %v956_v1  ;;  %v957_v27 = vadd.f32 %v1702_v15, %v934_v56 }
 0x12d   :  { %1266 = vtanh.f32 %v954_v33  ;;  %v955_v28 = vadd.f32 %v1702_v15, %v922_v10 }
 0x12e   :  { %1268 = vtanh.f32 %v957_v27 }
 0x12f   :  { %v1257_v53 = vpop.eup %1256  ;;  %1270 = vtanh.f32 %v955_v28 }
 0x130   :  { %v1259_v32 = vpop.eup %1258  ;;  %v1013_v37 = vrot.slane %v1257_v53, 6 }
 0x131   :  { %v1261_v29 = vpop.eup %1260  ;;  %v1015_v39 = vrot.slane %v1259_v32, 5 }
 0x132   :  { %v1011_v5 = vrot.slane %v1261_v29, 7  ;;  %v1263_v30 = vpop.eup %1262 }
 0x134   :  { %v1012_v42 = vsel %vm991_vm8, %v1011_v5, %v1263_v30 }
 0x135   :  { %v1014_v38 = vsel %vm994_vm9, %v1013_v37, %v1012_v42 }
 0x136   :  { %v1265_v40 = vpop.eup %1264  ;;  %v1016_v41 = vsel %vm997_vm10, %v1015_v39, %v1014_v38 }
 0x137   :  { %v1267_v8 = vpop.eup %1266  ;;  %v1021_v60 = vrot.slane %v1265_v40, 2 }
 0x138   :  { %v1269_v26 = vpop.eup %1268  ;;  %v1017_v36 = vrot.slane %v1267_v8, 4 }
 0x139   :  { %v1271_v15 = vpop.eup %1270  ;;  %v1023_v16 = vrot.slane %v1269_v26, 1 }
 0x13a   :  { %v1019_v7 = vrot.slane %v1271_v15, 3  ;;  %v1018_v24 = vsel %vm1000_vm11, %v1017_v36, %v1016_v41 }
 0x13c   :  { %v1020_v45 = vsel %vm1003_vm12, %v1019_v7, %v1018_v24 }
 0x13d   :  { %v1022_v46 = vsel %vm1006_vm13, %v1021_v60, %v1020_v45 }
 0x13e   :  { %v1024_v47 = vsel %vm1009_vm14, %v1023_v16, %v1022_v46 }
 0x13f   :  { %1028 = vst [vmem:[#allocation2 + $0x8] sm:$0xff] %v1024_v47 }
 0x140   :  { %1283 = shalt.err (!%p1280_p4)
}
 0x141   :  { %s1284_s4 = scalar_lea.hbm %s1752_s3, 256 }
 0x142   :  { %p1285_p5 = scmp.ne.s32.totalorder %s1752_s3, %s1284_s4  ;;  %p1288_p6 = scmp.lt.u32.totalorder %s1284_s4, %s1752_s3 }
 0x144   :  { %p1290_p7 = pnand %p1288_p6, %p1285_p5 }
 0x146   :  { %1293 = shalt.err (!%p1290_p7)
}
 0x147   :  { %s1297_s9 = smov 128   ;;  %s1298_s10 = smov 8  }
 0x148   :  { %1040 = dma.vmem_to_hbm [thread:$0]  %s1035_s27, 256, %s1752_s3, [#allocation3], %s1297_s9, %s1297_s9, %s1298_s10  }
 0x149   :  { %1294 = dma.done.wait [#allocation3], 256  }
 0x14a   :  { %1295 = vsyncadd [#allocation3], 4294967040 }
 0x14b   :  { %1044 = vsyncpa [#allocation3], 1 }

</bundles_post_ra>
